<compile_context>
chip_gen: v7x
topology: tpu7x:2x2x1
jax: 0.10.0
libtpu: 0.0.40
codegen_flags: <defaults>
</compile_context>

<pallas_src>
import math

import jax
import jax.numpy as jnp
from jax import lax
from jax.experimental import pallas as pl
from jax.experimental.pallas import tpu as pltpu


def _round_up(x, m):
    return (x + m - 1) // m * m


def _make_mha_kernel(n_head, d_k, d_v, seq_len, padded_len, inv_temper, eps):
    masked = padded_len > seq_len

    def kernel(x_ref, k_ref, v_ref, wq_ref, wp_ref, b_ref, g_ref, be_ref,
               out_ref, attn_ref):
        x_q = x_ref[...]                                        # (tq, D) native dtype

        # All-heads Q projection in one wide MXU matmul: (tq, D) x (D, H*d_k).
        q_all = jnp.dot(x_q, wq_ref[...],
                        preferred_element_type=jnp.float32) * inv_temper

        o_heads = []
        for h in range(n_head):                                 # static, unrolled
            q_h = q_all[:, h * d_k:(h + 1) * d_k].astype(k_ref.dtype)
            k_h = k_ref[h]                                      # (Lp, d_k)
            # scores = (Q / sqrt(d_k)) K^T   -- dropout on scores: identity (eval)
            scores = lax.dot_general(q_h, k_h, (((1,), (1,)), ((), ())),
                                     preferred_element_type=jnp.float32)  # (tq, Lp)
            if masked:
                key_idx = lax.broadcasted_iota(jnp.int32, scores.shape, 1)
                scores = jnp.where(key_idx < seq_len, scores, -1e30)

            m = jnp.max(scores, axis=-1, keepdims=True)
            e = jnp.exp(scores - m)
            denom = jnp.sum(e, axis=-1, keepdims=True)
            attn = e * pl.reciprocal(denom, approx=False)
            attn_ref[h] = attn.astype(attn_ref.dtype)

            o_heads.append(jnp.dot(attn.astype(v_ref.dtype), v_ref[h],
                                   preferred_element_type=jnp.float32))   # (tq, d_v)

        # One wide output projection on the concatenated head outputs:
        # (tq, H*d_v) x (H*d_v, D)  ==  concat_h(O_h) @ Wp^T
        o_cat = jnp.concatenate(o_heads, axis=-1).astype(wp_ref.dtype)
        y = jnp.dot(o_cat, wp_ref[...], preferred_element_type=jnp.float32)

        # proj bias + dropout(identity) + residual, LayerNorm in f32
        y = y + b_ref[...].astype(jnp.float32) + x_q.astype(jnp.float32)
        mu = jnp.mean(y, axis=-1, keepdims=True)
        var = jnp.mean(jnp.square(y - mu), axis=-1, keepdims=True)
        yn = (y - mu) * lax.rsqrt(var + eps)
        out_ref[...] = (yn * g_ref[...].astype(jnp.float32)
                        + be_ref[...].astype(jnp.float32)).astype(out_ref.dtype)

    return kernel


def multi_head_attention(q, k, v, params, *, eps=1e-5, attn_dtype=jnp.float32):
    """Pallas MHA forward. q/k/v: (1, L, d_model). Returns (out, attn)."""
    del k, v  # the reference module uses `q` for all three streams
    n_head, d_model, d_k = params["w_qs"].shape
    d_v = params["w_vs"].shape[2]
    mb, L, D = q.shape
    assert mb == 1 and D == d_model, "reference module is only consistent for mb=1"

    dtype = q.dtype
    itemsize = jnp.dtype(dtype).itemsize
    attn_itemsize = jnp.dtype(attn_dtype).itemsize

    # Generation-aware sizing (v5e/v6e: 128 MiB VMEM, v7x: 64 MiB).
    try:
        vmem_phys = int(pltpu.get_tpu_info().vmem_capacity_bytes)
    except Exception:
        vmem_phys = 64 * 1024 * 1024  # conservative fallback

    # Query-tile / padding choice: short sequences use one full tile padded to a
    # sublane multiple; long sequences use 256-row tiles when VMEM allows
    # (v5e/v6e) else 128-row tiles (v7x) -> lane-dense attn stores either way.
    sub = 8 if itemsize >= 4 else (16 if itemsize == 2 else 32)
    if L <= 128:
        tq = _round_up(L, sub)
        Lp = tq
    else:
        tq = 256 if vmem_phys >= 96 * 1024 * 1024 else 128
        Lp = _round_up(L, tq)

    x = q[0]
    if Lp != L:
        x = jnp.pad(x, ((0, Lp - L), (0, 0)))

    # --- Hoisted all-heads K/V projections: done ONCE with full-width matmuls,
    # fed to the kernel as VMEM-resident operands (no per-tile recomputation,
    # no lane-splitting of a fused K|V block inside the kernel).
    w_ks = params["w_ks"].astype(dtype)
    w_vs = params["w_vs"].astype(dtype)
    k_all = jnp.einsum("ld,hdk->hlk", x, w_ks).astype(dtype)        # (H, Lp, d_k)
    v_all = jnp.einsum("ld,hdv->hlv", x, w_vs).astype(dtype)        # (H, Lp, d_v)

    # All-heads Q weight as one wide (D, H*d_k) operand; output projection as
    # (H*d_v, D); bias / LayerNorm params as 2-D rows.
    wq_cat = jnp.transpose(params["w_qs"], (1, 0, 2)).reshape(D, n_head * d_k)
    wq_cat = wq_cat.astype(dtype)
    wp_cat = jnp.transpose(params["w_proj"]).astype(dtype)          # (H*d_v, D)
    b = params["b_proj"].reshape(1, D)
    g = params["gamma"].reshape(1, D)
    be = params["beta"].reshape(1, D)

    kernel = _make_mha_kernel(n_head, d_k, d_v, L, Lp, 1.0 / math.sqrt(d_k), eps)
    n_tiles = Lp // tq

    # Advisory cost estimate for the XLA scheduler (K/V pre-pass is outside).
    flops_per_tile = (2 * tq * D * n_head * d_k                 # wide Q projection
                      + n_head * 2 * tq * Lp * (d_k + d_v)      # scores + attn@V
                      + 2 * tq * n_head * d_v * D)              # wide output projection
    cost = pl.CostEstimate(
        flops=int(n_tiles * flops_per_tile),
        transcendentals=int(n_head * Lp * Lp),
        bytes_accessed=int(2 * Lp * D * itemsize                         # x in, out
                           + n_head * Lp * (d_k + d_v) * itemsize        # K, V
                           + (D * n_head * d_k + n_head * d_v * D) * itemsize
                           + 3 * D * 4
                           + n_head * Lp * Lp * attn_itemsize))          # attn writeback

    # VMEM budget: resident operands (x2 for default double-buffering), per-step
    # double-buffered streams, and live temporaries; clamped to the chip's
    # physical capacity with headroom.
    resident = (n_head * Lp * (d_k + d_v) * itemsize                     # K, V
                + (D * n_head * d_k + n_head * d_v * D) * itemsize       # Wq, Wp
                + 3 * _round_up(D, 128) * 4)                             # bias / LN
    per_step = (2 * 2 * tq * D * itemsize                                # x tile, out tile
                + 2 * n_head * tq * Lp * attn_itemsize)                  # attn block
    temps = (tq * n_head * d_k + 4 * tq * Lp
             + n_head * tq * d_v + 2 * tq * D) * 4
    vmem_est = 2 * resident + per_step + temps
    vmem_cap = min(int(0.75 * vmem_phys), 100 * 1024 * 1024)
    vmem_limit = int(min(max(vmem_est, 8 * 1024 * 1024), vmem_cap))

    out, attn = pl.pallas_call(
        kernel,
        out_shape=(jax.ShapeDtypeStruct((Lp, D), dtype),
                   jax.ShapeDtypeStruct((n_head, Lp, Lp), attn_dtype)),
        grid_spec=pltpu.PrefetchScalarGridSpec(
            num_scalar_prefetch=0,
            grid=(n_tiles,),
            in_specs=[
                pl.BlockSpec((tq, D), lambda i: (i, 0)),                   # x query tile
                pl.BlockSpec((n_head, Lp, d_k), lambda i: (0, 0, 0)),      # K (resident)
                pl.BlockSpec((n_head, Lp, d_v), lambda i: (0, 0, 0)),      # V (resident)
                pl.BlockSpec((D, n_head * d_k), lambda i: (0, 0)),         # Wq all heads
                pl.BlockSpec((n_head * d_v, D), lambda i: (0, 0)),         # Wp^T
                pl.BlockSpec((1, D), lambda i: (0, 0)),                    # proj bias
                pl.BlockSpec((1, D), lambda i: (0, 0)),                    # ln gamma
                pl.BlockSpec((1, D), lambda i: (0, 0)),                    # ln beta
            ],
            out_specs=[
                pl.BlockSpec((tq, D), lambda i: (i, 0)),                   # output tile
                pl.BlockSpec((n_head, tq, Lp), lambda i: (0, i, 0)),       # attn per q-tile
            ],
        ),
        compiler_params=pltpu.CompilerParams(
            dimension_semantics=("parallel",),
            vmem_limit_bytes=vmem_limit),
        cost_estimate=cost,
    )(x, k_all, v_all, wq_cat, wp_cat, b, g, be)

    return out[:L][None], attn[:, :L, :L]


def reference_mha(q, params, *, eps=1e-5):
    """Pure-JAX reference matching the PyTorch forward (eval mode, mb=1)."""
    n_head, D, d_k = params["w_qs"].shape
    mb, L, _ = q.shape
    x = jnp.broadcast_to(q, (n_head, L, D))
    qs = jnp.einsum("hld,hdk->hlk", x, params["w_qs"])
    ks = jnp.einsum("hld,hdk->hlk", x, params["w_ks"])
    vs = jnp.einsum("hld,hdv->hlv", x, params["w_vs"])
    scores = jnp.einsum("hqe,hke->hqk", qs, ks) / math.sqrt(d_k)
    attn = jax.nn.softmax(scores, axis=-1)
    out = jnp.einsum("hqk,hkv->hqv", attn, vs)                     # (h, L, d_v)
    cat = jnp.concatenate([out[h] for h in range(n_head)], axis=-1)[None]
    proj = cat @ params["w_proj"].T + params["b_proj"]
    y = proj + q
    mu = y.mean(-1, keepdims=True)
    var = ((y - mu) ** 2).mean(-1, keepdims=True)
    yn = (y - mu) / jnp.sqrt(var + eps)
    return yn * params["gamma"] + params["beta"], attn


def init_params(key, n_head, d_model, d_k, d_v):
    ks = jax.random.split(key, 6)
    std_qk = math.sqrt(2.0 / (d_model + d_k))   # xavier_normal
    std_v = math.sqrt(2.0 / (d_model + d_v))
    std_p = math.sqrt(1.0 / (n_head * d_v))
    return {
        "w_qs": std_qk * jax.random.normal(ks[0], (n_head, d_model, d_k), jnp.float32),
        "w_ks": std_qk * jax.random.normal(ks[1], (n_head, d_model, d_k), jnp.float32),
        "w_vs": std_v * jax.random.normal(ks[2], (n_head, d_model, d_v), jnp.float32),
        "w_proj": std_p * jax.random.normal(ks[3], (d_model, n_head * d_v), jnp.float32),
        "b_proj": 0.01 * jax.random.normal(ks[4], (d_model,), jnp.float32),
        "gamma": jnp.ones((d_model,), jnp.float32),
        "beta": jnp.zeros((d_model,), jnp.float32),
    }


if __name__ == "__main__":
    n_head, d_model, d_k, d_v = 2, 32, 16, 16
    mb, L = 1, 8   # the reference module's expand/view chain requires mb == 1

    key = jax.random.PRNGKey(0)
    kp, kq, kk, kv = jax.random.split(key, 4)
    params = init_params(kp, n_head, d_model, d_k, d_v)

    q = jax.random.normal(kq, (mb, L, d_model), jnp.float32)
    k = jax.random.normal(kk, (mb, L, d_model), jnp.float32)
    v = jax.random.normal(kv, (mb, L, d_model), jnp.float32)

    out, attn = multi_head_attention(q, k, v, params)
    jax.block_until_ready((out, attn))

    ref_out, ref_attn = reference_mha(q, params)
    assert out.shape == (mb, L, d_model) and attn.shape == (n_head, L, L)
    assert jnp.allclose(out, ref_out, atol=2e-4, rtol=2e-4)
    assert jnp.allclose(attn, ref_attn, atol=2e-5, rtol=2e-5)

    print("KERNEL_OK")
</pallas_src>

<mosaic_0001>
module attributes {stable_mosaic.version = 11 : i64} {
  func.func @kernel(%arg0: i32, %arg1: memref<8x32xf32, #tpu.memory_space<vmem>>, %arg2: memref<2x8x16xf32, #tpu.memory_space<vmem>>, %arg3: memref<2x8x16xf32, #tpu.memory_space<vmem>>, %arg4: memref<32x32xf32, #tpu.memory_space<vmem>>, %arg5: memref<32x32xf32, #tpu.memory_space<vmem>>, %arg6: memref<1x32xf32, #tpu.memory_space<vmem>>, %arg7: memref<1x32xf32, #tpu.memory_space<vmem>>, %arg8: memref<1x32xf32, #tpu.memory_space<vmem>>, %arg9: memref<8x32xf32, #tpu.memory_space<vmem>>, %arg10: memref<2x8x8xf32, #tpu.memory_space<vmem>>) attributes {dimension_semantics = [#tpu.dimension_semantics<parallel>], iteration_bounds = array<i64: 1>, scalar_prefetch = 0 : i64, scratch_operands = 0 : i64, tpu.core_type = #tpu.core_type<tc>, window_params = [{transform_indices = @transform_0, window_bounds = array<i64: 8, 32>}, {pipeline_mode = #tpu.pipeline_mode<synchronous>, transform_indices = @transform_1, window_bounds = array<i64: 2, 8, 16>}, {pipeline_mode = #tpu.pipeline_mode<synchronous>, transform_indices = @transform_2, window_bounds = array<i64: 2, 8, 16>}, {pipeline_mode = #tpu.pipeline_mode<synchronous>, transform_indices = @transform_3, window_bounds = array<i64: 32, 32>}, {pipeline_mode = #tpu.pipeline_mode<synchronous>, transform_indices = @transform_4, window_bounds = array<i64: 32, 32>}, {pipeline_mode = #tpu.pipeline_mode<synchronous>, transform_indices = @transform_5, window_bounds = array<i64: 1, 32>}, {pipeline_mode = #tpu.pipeline_mode<synchronous>, transform_indices = @transform_6, window_bounds = array<i64: 1, 32>}, {pipeline_mode = #tpu.pipeline_mode<synchronous>, transform_indices = @transform_7, window_bounds = array<i64: 1, 32>}, {transform_indices = @transform_8, window_bounds = array<i64: 8, 32>}, {transform_indices = @transform_9, window_bounds = array<i64: 2, 8, 8>}]} {
    %c0 = arith.constant 0 : index
    %c0_0 = arith.constant 0 : index
    %0 = vector.load %arg1[%c0, %c0_0] : memref<8x32xf32, #tpu.memory_space<vmem>>, vector<8x32xf32>
    %c0_1 = arith.constant 0 : index
    %c0_2 = arith.constant 0 : index
    %1 = vector.load %arg4[%c0_1, %c0_2] : memref<32x32xf32, #tpu.memory_space<vmem>>, vector<32x32xf32>
    %cst = arith.constant dense<0.000000e+00> : vector<8x32xf32>
    %2 = tpu.matmul %0, %1, %cst {dimension_numbers = #tpu.dot_dimension_numbers<[1], [0], [0], [1], [0, 0, 1, 1], [], []>} : vector<8x32xf32>, vector<32x32xf32>, vector<8x32xf32> -> vector<8x32xf32>
    %cst_3 = arith.constant 2.500000e-01 : f32
    %3 = vector.broadcast %cst_3 : f32 to vector<8x32xf32>
    %4 = arith.mulf %2, %3 : vector<8x32xf32>
    %5 = vector.extract_strided_slice %4 {offsets = [0, 0], sizes = [8, 16], strides = [1, 1]} : vector<8x32xf32> to vector<8x16xf32>
    %c0_4 = arith.constant 0 : index
    %c0_5 = arith.constant 0 : index
    %c0_6 = arith.constant 0 : index
    %6 = vector.load %arg2[%c0_4, %c0_5, %c0_6] : memref<2x8x16xf32, #tpu.memory_space<vmem>>, vector<1x8x16xf32>
    %7 = vector.shape_cast %6 : vector<1x8x16xf32> to vector<8x16xf32>
    %cst_7 = arith.constant dense<0.000000e+00> : vector<8x8xf32>
    %8 = tpu.matmul %5, %7, %cst_7 {dimension_numbers = #tpu.dot_dimension_numbers<[1], [1], [0], [0], [0, 0, 1, 0], [], []>} : vector<8x16xf32>, vector<8x16xf32>, vector<8x8xf32> -> vector<8x8xf32>
    %cst_8 = arith.constant dense<0xFF800000> : vector<8xf32>
    %9 = vector.multi_reduction <maximumf>, %8, %cst_8 [1] : vector<8x8xf32> to vector<8xf32>
    %10 = vector.shape_cast %9 : vector<8xf32> to vector<8x1xf32>
    %11 = vector.broadcast %10 : vector<8x1xf32> to vector<8x8xf32>
    %12 = arith.subf %8, %11 : vector<8x8xf32>
    %13 = math.exp %12 : vector<8x8xf32>
    %cst_9 = arith.constant dense<0.000000e+00> : vector<8xf32>
    %14 = vector.multi_reduction <add>, %13, %cst_9 [1] : vector<8x8xf32> to vector<8xf32>
    %15 = vector.shape_cast %14 : vector<8xf32> to vector<8x1xf32>
    %16 = tpu.reciprocal %15 : vector<8x1xf32> -> vector<8x1xf32>
    %17 = vector.broadcast %16 : vector<8x1xf32> to vector<8x8xf32>
    %18 = arith.mulf %13, %17 : vector<8x8xf32>
    %c0_10 = arith.constant 0 : index
    %c0_11 = arith.constant 0 : index
    %c0_12 = arith.constant 0 : index
    %19 = vector.load %arg10[%c0_10, %c0_11, %c0_12] : memref<2x8x8xf32, #tpu.memory_space<vmem>>, vector<1x8x8xf32>
    %20 = vector.shape_cast %19 : vector<1x8x8xf32> to vector<8x8xf32>
    %21 = vector.shape_cast %18 : vector<8x8xf32> to vector<1x8x8xf32>
    tpu.vector_store %arg10[%c0_10, %c0_11, %c0_12], %21 {strides = array<i32>} : memref<2x8x8xf32, #tpu.memory_space<vmem>>, vector<1x8x8xf32>,
    %c0_13 = arith.constant 0 : index
    %c0_14 = arith.constant 0 : index
    %c0_15 = arith.constant 0 : index
    %22 = vector.load %arg3[%c0_13, %c0_14, %c0_15] : memref<2x8x16xf32, #tpu.memory_space<vmem>>, vector<1x8x16xf32>
    %23 = vector.shape_cast %22 : vector<1x8x16xf32> to vector<8x16xf32>
    %cst_16 = arith.constant dense<0.000000e+00> : vector<8x16xf32>
    %24 = tpu.matmul %18, %23, %cst_16 {dimension_numbers = #tpu.dot_dimension_numbers<[1], [0], [0], [1], [0, 0, 1, 1], [], []>} : vector<8x8xf32>, vector<8x16xf32>, vector<8x16xf32> -> vector<8x16xf32>
    %25 = vector.extract_strided_slice %4 {offsets = [0, 16], sizes = [8, 16], strides = [1, 1]} : vector<8x32xf32> to vector<8x16xf32>
    %c1 = arith.constant 1 : index
    %c0_17 = arith.constant 0 : index
    %c0_18 = arith.constant 0 : index
    %26 = vector.load %arg2[%c1, %c0_17, %c0_18] : memref<2x8x16xf32, #tpu.memory_space<vmem>>, vector<1x8x16xf32>
    %27 = vector.shape_cast %26 : vector<1x8x16xf32> to vector<8x16xf32>
    %cst_19 = arith.constant dense<0.000000e+00> : vector<8x8xf32>
    %28 = tpu.matmul %25, %27, %cst_19 {dimension_numbers = #tpu.dot_dimension_numbers<[1], [1], [0], [0], [0, 0, 1, 0], [], []>} : vector<8x16xf32>, vector<8x16xf32>, vector<8x8xf32> -> vector<8x8xf32>
    %cst_20 = arith.constant dense<0xFF800000> : vector<8xf32>
    %29 = vector.multi_reduction <maximumf>, %28, %cst_20 [1] : vector<8x8xf32> to vector<8xf32>
    %30 = vector.shape_cast %29 : vector<8xf32> to vector<8x1xf32>
    %31 = vector.broadcast %30 : vector<8x1xf32> to vector<8x8xf32>
    %32 = arith.subf %28, %31 : vector<8x8xf32>
    %33 = math.exp %32 : vector<8x8xf32>
    %cst_21 = arith.constant dense<0.000000e+00> : vector<8xf32>
    %34 = vector.multi_reduction <add>, %33, %cst_21 [1] : vector<8x8xf32> to vector<8xf32>
    %35 = vector.shape_cast %34 : vector<8xf32> to vector<8x1xf32>
    %36 = tpu.reciprocal %35 : vector<8x1xf32> -> vector<8x1xf32>
    %37 = vector.broadcast %36 : vector<8x1xf32> to vector<8x8xf32>
    %38 = arith.mulf %33, %37 : vector<8x8xf32>
    %c1_22 = arith.constant 1 : index
    %c0_23 = arith.constant 0 : index
    %c0_24 = arith.constant 0 : index
    %39 = vector.load %arg10[%c1_22, %c0_23, %c0_24] : memref<2x8x8xf32, #tpu.memory_space<vmem>>, vector<1x8x8xf32>
    %40 = vector.shape_cast %39 : vector<1x8x8xf32> to vector<8x8xf32>
    %41 = vector.shape_cast %38 : vector<8x8xf32> to vector<1x8x8xf32>
    tpu.vector_store %arg10[%c1_22, %c0_23, %c0_24], %41 {strides = array<i32>} : memref<2x8x8xf32, #tpu.memory_space<vmem>>, vector<1x8x8xf32>,
    %c1_25 = arith.constant 1 : index
    %c0_26 = arith.constant 0 : index
    %c0_27 = arith.constant 0 : index
    %42 = vector.load %arg3[%c1_25, %c0_26, %c0_27] : memref<2x8x16xf32, #tpu.memory_space<vmem>>, vector<1x8x16xf32>
    %43 = vector.shape_cast %42 : vector<1x8x16xf32> to vector<8x16xf32>
    %cst_28 = arith.constant dense<0.000000e+00> : vector<8x16xf32>
    %44 = tpu.matmul %38, %43, %cst_28 {dimension_numbers = #tpu.dot_dimension_numbers<[1], [0], [0], [1], [0, 0, 1, 1], [], []>} : vector<8x8xf32>, vector<8x16xf32>, vector<8x16xf32> -> vector<8x16xf32>
    %45 = tpu.concatenate %24, %44 in 1 : vector<8x16xf32>, vector<8x16xf32> -> vector<8x32xf32>
    %c0_29 = arith.constant 0 : index
    %c0_30 = arith.constant 0 : index
    %46 = vector.load %arg5[%c0_29, %c0_30] : memref<32x32xf32, #tpu.memory_space<vmem>>, vector<32x32xf32>
    %cst_31 = arith.constant dense<0.000000e+00> : vector<8x32xf32>
    %47 = tpu.matmul %45, %46, %cst_31 {dimension_numbers = #tpu.dot_dimension_numbers<[1], [0], [0], [1], [0, 0, 1, 1], [], []>} : vector<8x32xf32>, vector<32x32xf32>, vector<8x32xf32> -> vector<8x32xf32>
    %c0_32 = arith.constant 0 : index
    %c0_33 = arith.constant 0 : index
    %48 = vector.load %arg6[%c0_32, %c0_33] : memref<1x32xf32, #tpu.memory_space<vmem>>, vector<1x32xf32>
    %49 = vector.broadcast %48 : vector<1x32xf32> to vector<8x32xf32>
    %50 = arith.addf %47, %49 : vector<8x32xf32>
    %51 = arith.addf %50, %0 : vector<8x32xf32>
    %cst_34 = arith.constant dense<0.000000e+00> : vector<8xf32>
    %52 = vector.multi_reduction <add>, %51, %cst_34 [1] : vector<8x32xf32> to vector<8xf32>
    %53 = vector.shape_cast %52 : vector<8xf32> to vector<8x1xf32>
    %cst_35 = arith.constant 3.200000e+01 : f32
    %54 = vector.broadcast %cst_35 : f32 to vector<8x1xf32>
    %55 = arith.divf %53, %54 : vector<8x1xf32>
    %56 = vector.broadcast %55 : vector<8x1xf32> to vector<8x32xf32>
    %57 = arith.subf %51, %56 : vector<8x32xf32>
    %58 = arith.mulf %57, %57 : vector<8x32xf32>
    %cst_36 = arith.constant dense<0.000000e+00> : vector<8xf32>
    %59 = vector.multi_reduction <add>, %58, %cst_36 [1] : vector<8x32xf32> to vector<8xf32>
    %60 = vector.shape_cast %59 : vector<8xf32> to vector<8x1xf32>
    %cst_37 = arith.constant 3.200000e+01 : f32
    %61 = vector.broadcast %cst_37 : f32 to vector<8x1xf32>
    %62 = arith.divf %60, %61 : vector<8x1xf32>
    %63 = vector.broadcast %55 : vector<8x1xf32> to vector<8x32xf32>
    %64 = arith.subf %51, %63 : vector<8x32xf32>
    %cst_38 = arith.constant 9.99999974E-6 : f32
    %65 = vector.broadcast %cst_38 : f32 to vector<8x1xf32>
    %66 = arith.addf %62, %65 : vector<8x1xf32>
    %67 = math.rsqrt %66 : vector<8x1xf32>
    %68 = vector.broadcast %67 : vector<8x1xf32> to vector<8x32xf32>
    %69 = arith.mulf %64, %68 : vector<8x32xf32>
    %c0_39 = arith.constant 0 : index
    %c0_40 = arith.constant 0 : index
    %70 = vector.load %arg7[%c0_39, %c0_40] : memref<1x32xf32, #tpu.memory_space<vmem>>, vector<1x32xf32>
    %71 = vector.broadcast %70 : vector<1x32xf32> to vector<8x32xf32>
    %72 = arith.mulf %69, %71 : vector<8x32xf32>
    %c0_41 = arith.constant 0 : index
    %c0_42 = arith.constant 0 : index
    %73 = vector.load %arg8[%c0_41, %c0_42] : memref<1x32xf32, #tpu.memory_space<vmem>>, vector<1x32xf32>
    %74 = vector.broadcast %73 : vector<1x32xf32> to vector<8x32xf32>
    %75 = arith.addf %72, %74 : vector<8x32xf32>
    %c0_43 = arith.constant 0 : index
    %c0_44 = arith.constant 0 : index
    %76 = vector.load %arg9[%c0_43, %c0_44] : memref<8x32xf32, #tpu.memory_space<vmem>>, vector<8x32xf32>
    tpu.vector_store %arg9[%c0_43, %c0_44], %75 {strides = array<i32>} : memref<8x32xf32, #tpu.memory_space<vmem>>, vector<8x32xf32>,
    return
  }
  func.func @transform_0(%arg0: i32) -> (i32, i32) {
    %c0_i32 = arith.constant 0 : i32
    %c0_i32_0 = arith.constant 0 : i32
    return %arg0, %c0_i32 : i32, i32
  }
  func.func @transform_1(%arg0: i32) -> (i32, i32, i32) {
    %c0_i32 = arith.constant 0 : i32
    %c0_i32_0 = arith.constant 0 : i32
    %c0_i32_1 = arith.constant 0 : i32
    %c0_i32_2 = arith.constant 0 : i32
    return %c0_i32, %c0_i32_0, %c0_i32_1 : i32, i32, i32
  }
  func.func @transform_2(%arg0: i32) -> (i32, i32, i32) {
    %c0_i32 = arith.constant 0 : i32
    %c0_i32_0 = arith.constant 0 : i32
    %c0_i32_1 = arith.constant 0 : i32
    %c0_i32_2 = arith.constant 0 : i32
    return %c0_i32, %c0_i32_0, %c0_i32_1 : i32, i32, i32
  }
  func.func @transform_3(%arg0: i32) -> (i32, i32) {
    %c0_i32 = arith.constant 0 : i32
    %c0_i32_0 = arith.constant 0 : i32
    %c0_i32_1 = arith.constant 0 : i32
    return %c0_i32, %c0_i32_0 : i32, i32
  }
  func.func @transform_4(%arg0: i32) -> (i32, i32) {
    %c0_i32 = arith.constant 0 : i32
    %c0_i32_0 = arith.constant 0 : i32
    %c0_i32_1 = arith.constant 0 : i32
    return %c0_i32, %c0_i32_0 : i32, i32
  }
  func.func @transform_5(%arg0: i32) -> (i32, i32) {
    %c0_i32 = arith.constant 0 : i32
    %c0_i32_0 = arith.constant 0 : i32
    %c0_i32_1 = arith.constant 0 : i32
    return %c0_i32, %c0_i32_0 : i32, i32
  }
  func.func @transform_6(%arg0: i32) -> (i32, i32) {
    %c0_i32 = arith.constant 0 : i32
    %c0_i32_0 = arith.constant 0 : i32
    %c0_i32_1 = arith.constant 0 : i32
    return %c0_i32, %c0_i32_0 : i32, i32
  }
  func.func @transform_7(%arg0: i32) -> (i32, i32) {
    %c0_i32 = arith.constant 0 : i32
    %c0_i32_0 = arith.constant 0 : i32
    %c0_i32_1 = arith.constant 0 : i32
    return %c0_i32, %c0_i32_0 : i32, i32
  }
  func.func @transform_8(%arg0: i32) -> (i32, i32) {
    %c0_i32 = arith.constant 0 : i32
    %c0_i32_0 = arith.constant 0 : i32
    return %arg0, %c0_i32 : i32, i32
  }
  func.func @transform_9(%arg0: i32) -> (i32, i32, i32) {
    %c0_i32 = arith.constant 0 : i32
    %c0_i32_0 = arith.constant 0 : i32
    %c0_i32_1 = arith.constant 0 : i32
    return %c0_i32, %arg0, %c0_i32_0 : i32, i32, i32
  }
}

</mosaic_0001>

<bundles_post_ra>
// kernel: tpu_custom_call.1
= control target key start
LH: loop header
LB: loop body
LE: loop exit
PB: predicated region body
PF: predicated region fallthrough
CT: control target
= control target key end

     0   :  { %15 = vsyncpa [#allocation3], 0  ;;  %s1140_s0 = inlined_call_operand.hbm [shape: f32[8,32], index: 0, kind: input, shape index: {}]   ;;  %s1141_s1 = inlined_call_operand.hbm [shape: f32[2,8,16], index: 1, kind: input, shape index: {}]   ;;  %s1142_s2 = inlined_call_operand.hbm [shape: f32[2,8,16], index: 2, kind: input, shape index: {}]   ;;  %s1143_s3 = inlined_call_operand.hbm [shape: f32[32,32], index: 3, kind: input, shape index: {}]   ;;  %s1144_s4 = inlined_call_operand.hbm [shape: f32[32,32], index: 4, kind: input, shape index: {}]   ;;  %s1145_s5 = inlined_call_operand.vmem [shape: f32[1,32], index: 5, kind: input, shape index: {}]   ;;  %s1146_s6 = inlined_call_operand.vmem [shape: f32[1,32], index: 6, kind: input, shape index: {}]   ;;  %s1147_s7 = inlined_call_operand.vmem [shape: f32[1,32], index: 7, kind: input, shape index: {}]   ;;  %s1148_s8 = inlined_call_operand.hbm [shape: f32[8,32], index: 8, kind: output, shape index: {0}]   ;;  %s1149_s9 = inlined_call_operand.hbm [shape: f32[2,8,8], index: 9, kind: output, shape index: {1}]  }
   0x1   :  { %16 = vsyncpa [#allocation6], 0 }
   0x2   :  { %17 = vsyncpa [#allocation9], 0 }
   0x3   :  { %18 = vsyncpa [#allocation4], 0 }
   0x4   :  { %19 = vsyncpa [#allocation13], 0  ;;  %s936_s30 = smov [#allocation5]   ;;  %s772_s13 = scalar_lea.hbm %s1141_s1, 256 }
   0x5   :  { %s35_s10 = sshll.u32 %s936_s30, 4  ;;  %p773_p0 = scmp.ne.s32.totalorder %s1141_s1, %s772_s13  ;;  %s36_s10 = int_to_ptr.vmem [resolvable:$true] %s35_s10 }
   0x6   :  { %p776_p1 = scmp.lt.u32.totalorder %s772_s13, %s1141_s1 }
   0x8   :  { %p778_p2 = pnand %p776_p1, %p773_p0 }
   0xa   :  { %781 = shalt.err (!%p778_p2)
}
   0xb   :  { %s782_s18 = scalar_lea.vmem %s36_s10, 256  ;;  %p787_p4 = scmp.lt.s32.totalorder %s36_s10, %s36_s10 }
   0xc   :  { %p783_p3 = scmp.ne.s32.totalorder %s36_s10, %s782_s18  ;;  %p788_p5 = scmp.lt.s32.totalorder %s782_s18, %s782_s18 }
   0xe   :  { %p789_p6 = por %p788_p5, %p787_p4 }
  0x10   :  { %p790_p7 = pnand %p789_p6, %p783_p3 }
  0x12   :  { %793 = shalt.err (!%p790_p7)
}
  0x13   :  { %s937_s19 = smov 128   ;;  %s938_s20 = smov 8  }
  0x14   :  { %41 = dma.hbm_to_vmem [thread:$0]  %s1141_s1, 256, %s36_s10, [#allocation6], %s937_s19, %s937_s19, %s938_s20  }
  0x15   :  { %s939_s23 = smov [#allocation8]   ;;  %s940_s25 = smov [#allocation2]  }
  0x16   :  { %s59_s24 = sshll.u32 %s939_s23, 4  ;;  %s26_s26 = sshll.u32 %s940_s25, 4  ;;  %s60_s24 = int_to_ptr.vmem [resolvable:$true] %s59_s24  ;;  %s27_s26 = int_to_ptr.vmem [resolvable:$true] %s26_s26 }
  0x17   :  { %s794_s29 = scalar_lea.hbm %s1143_s3, 512 }
  0x18   :  { %p795_p8 = scmp.ne.s32.totalorder %s1143_s3, %s794_s29  ;;  %p798_p9 = scmp.lt.u32.totalorder %s794_s29, %s1143_s3 }
  0x1a   :  { %p800_p10 = pnand %p798_p9, %p795_p8 }
  0x1c   :  { %803 = shalt.err (!%p800_p10)
}
  0x1d   :  { %s804_s1 = scalar_lea.vmem %s60_s24, 512  ;;  %p809_p12 = scmp.lt.s32.totalorder %s60_s24, %s60_s24 }
  0x1e   :  { %p805_p11 = scmp.ne.s32.totalorder %s60_s24, %s804_s1  ;;  %p810_p13 = scmp.lt.s32.totalorder %s804_s1, %s804_s1 }
  0x20   :  { %p811_p0 = por %p810_p13, %p809_p12 }
  0x22   :  { %p812_p1 = pnand %p811_p0, %p805_p11 }
  0x24   :  { %815 = shalt.err (!%p812_p1)
}
  0x25   :  { %65 = dma.hbm_to_vmem [thread:$0]  %s1143_s3, 512, %s60_s24, [#allocation9], %s937_s19, %s937_s19, %s938_s20  }
  0x26   :  { %s816_s17 = scalar_lea.hbm %s1140_s0, 128 }
  0x27   :  { %p817_p2 = scmp.ne.s32.totalorder %s1140_s0, %s816_s17  ;;  %p820_p3 = scmp.lt.u32.totalorder %s816_s17, %s1140_s0 }
  0x29   :  { %p822_p4 = pnand %p820_p3, %p817_p2 }
  0x2b   :  { %825 = shalt.err (!%p822_p4)
}
  0x2c   :  { %s826_s25 = scalar_lea.vmem %s27_s26, 128  ;;  %p831_p6 = scmp.lt.s32.totalorder %s27_s26, %s27_s26 }
  0x2d   :  { %p827_p5 = scmp.ne.s32.totalorder %s27_s26, %s826_s25  ;;  %p832_p7 = scmp.lt.s32.totalorder %s826_s25, %s826_s25 }
  0x2f   :  { %p833_p8 = por %p832_p7, %p831_p6 }
  0x31   :  { %p834_p9 = pnand %p833_p8, %p827_p5 }
  0x33   :  { %837 = shalt.err (!%p834_p9)
}
  0x34   :  { %29 = dma.hbm_to_vmem [thread:$0]  %s1140_s0, 128, %s27_s26, [#allocation3]  }
  0x35   :  { %s941_s27 = smov [#allocation7]   ;;  %s942_s29 = smov [#allocation10]  }
  0x36   :  { %s47_s28 = sshll.u32 %s941_s27, 4  ;;  %s71_s30 = sshll.u32 %s942_s29, 4  ;;  %s48_s28 = int_to_ptr.vmem [resolvable:$true] %s47_s28  ;;  %s72_s30 = int_to_ptr.vmem [resolvable:$true] %s71_s30 }
  0x37   :  { %s838_s13 = scalar_lea.hbm %s1142_s2, 256 }
  0x38   :  { %p839_p10 = scmp.ne.s32.totalorder %s1142_s2, %s838_s13  ;;  %p842_p11 = scmp.lt.u32.totalorder %s838_s13, %s1142_s2 }
  0x3a   :  { %p844_p12 = pnand %p842_p11, %p839_p10 }
  0x3c   :  { %847 = shalt.err (!%p844_p12)
}
  0x3d   :  { %s848_s0 = scalar_lea.vmem %s48_s28, 256  ;;  %p853_p0 = scmp.lt.s32.totalorder %s48_s28, %s48_s28 }
  0x3e   :  { %p849_p13 = scmp.ne.s32.totalorder %s48_s28, %s848_s0  ;;  %p854_p1 = scmp.lt.s32.totalorder %s848_s0, %s848_s0 }
  0x40   :  { %p855_p2 = por %p854_p1, %p853_p0 }
  0x42   :  { %p856_p3 = pnand %p855_p2, %p849_p13 }
  0x44   :  { %859 = shalt.err (!%p856_p3)
}
  0x45   :  { %53 = dma.hbm_to_vmem [thread:$0]  %s1142_s2, 256, %s48_s28, [#allocation6], %s937_s19, %s937_s19, %s938_s20  }
  0x46   :  { %s860_s21 = scalar_lea.hbm %s1144_s4, 512 }
  0x47   :  { %p861_p4 = scmp.ne.s32.totalorder %s1144_s4, %s860_s21  ;;  %p864_p5 = scmp.lt.u32.totalorder %s860_s21, %s1144_s4 }
  0x49   :  { %p866_p6 = pnand %p864_p5, %p861_p4 }
  0x4b   :  { %869 = shalt.err (!%p866_p6)
}
  0x4c   :  { %s870_s24 = scalar_lea.vmem %s72_s30, 512  ;;  %p875_p8 = scmp.lt.s32.totalorder %s72_s30, %s72_s30 }
  0x4d   :  { %p871_p7 = scmp.ne.s32.totalorder %s72_s30, %s870_s24  ;;  %p876_p9 = scmp.lt.s32.totalorder %s870_s24, %s870_s24 }
  0x4f   :  { %p877_p10 = por %p876_p9, %p875_p8 }
  0x51   :  { %p878_p11 = pnand %p877_p10, %p871_p7 }
  0x53   :  { %881 = shalt.err (!%p878_p11)
}
  0x54   :  { %77 = dma.hbm_to_vmem [thread:$0]  %s1144_s4, 512, %s72_s30, [#allocation9], %s937_s19, %s937_s19, %s938_s20  }
  0x55   :  { %926 = dma.done.wait [#allocation3], 128  }
  0x56   :  { %927 = vsyncadd [#allocation3], 4294967168 }
  0x57   :  { %928 = dma.done.wait [#allocation6], 512  }
  0x58   :  { %929 = vsyncadd [#allocation6], 4294966784 }
  0x59   :  { %930 = dma.done.wait [#allocation9], 1024  }
  0x5a   :  { %931 = vsyncadd [#allocation9], 4294966272  ;;  %v943_v0 = vmov 0.0|0.0   ;;  %vm944_vm0 = vmmov 0   ;;  %v945_v1 = vmov 0.0   ;;  %v100_v2 = vld [vmem:[#allocation8] sm:$0xff] }
  0x5b   :  { %736 = vmatprep.subr.bf16.mxu0 %v943_v0  ;;  %702 = vmatprep.mubr.msk.f32.mxu0 %vm944_vm0, %v945_v1  ;;  %v101_v3 = vld [vmem:[#allocation8 + $0x8] sm:$0xff]  ;;  %v102_v4 = vld [vmem:[#allocation8 + $0x10] sm:$0xff]  ;;  %v103_v6 = vld [vmem:[#allocation8 + $0x18] sm:$0xff]  ;;  %vm104_vm1 = vcmask 261120   ;;  %vm180_vm2 = vcmask 130048   ;;  %s946_s4 = smov 112  }
  0x5c   :  { %705 = vmatprep.subr.mxu1 %v945_v1  ;;  %707 = vmatprep.mubr.msk.f32.mxu1 %vm944_vm0, %v945_v1  ;;  %v737_v5 = vpack.c.bf16 %v101_v3, %v100_v2  ;;  %v740_v7 = vpack.c.bf16 %v103_v6, %v102_v4  ;;  %v1076_v8 = vld [vmem:[#allocation2] sm:$0xff]  ;;  %v179_v9 = vld [vmem:[#allocation5] sm:$0xff]  ;;  %vm257_vm3 = vcmask 64512   ;;  %v270_v21 = vld [vmem:[#allocation7] sm:$0xff]  ;;  %s947_s28 = smov 16   ;;  %s948_s11 = smov [#allocation12]  }
  0x5d   :  { %706 = vmatpush3.xpose.msk.msra.mxu1 %vm180_vm2, %v179_v9  ;;  %v345_v25 = vld [vmem:[#allocation5 + $0x8] sm:$0xff]  ;;  %v437_v37 = vld [vmem:[#allocation7 + $0x8] sm:$0xff]  ;;  %v516_v41 = vld [vmem:[#allocation10] sm:$0xff]  ;;  %s647_s12 = sshll.u32 %s948_s11, 4  ;;  %s648_s12 = int_to_ptr.vmem [resolvable:$true] %s647_s12 }
  0x5e   :  { %738 = vmatpush3.bf16.msra.mxu0 %v737_v5  ;;  %710 = vmatprep.subr.mxu1 %v945_v1  ;;  %v517_v42 = vld [vmem:[#allocation10 + $0x8] sm:$0xff]  ;;  %v518_v43 = vld [vmem:[#allocation10 + $0x10] sm:$0xff]  ;;  %v519_v45 = vld [vmem:[#allocation10 + $0x18] sm:$0xff]  ;;  %s882_s13 = scalar_lea.vmem %s648_s12, 256  ;;  %p887_p13 = scmp.lt.s32.totalorder %s648_s12, %s648_s12 }
  0x5f   :  { %739 = vmatprep.subr.bf16.mxu0 %v943_v0  ;;  %v743_v44 = vpack.c.bf16 %v517_v42, %v516_v41  ;;  %v746_v46 = vpack.c.bf16 %v519_v45, %v518_v43  ;;  %v672_v51 = vld [vmem:[%s1145_s5] ss:$0 sm:$0xff]  ;;  %p883_p12 = scmp.ne.s32.totalorder %s648_s12, %s882_s13  ;;  %p888_p0 = scmp.lt.s32.totalorder %s882_s13, %s882_s13 }
  0x61   :  { %p889_p1 = por %p888_p0, %p887_p13 }
  0x62   :  { %741 = vmatpush3.bf16.msra.mxu0 %v740_v7 }
  0x63   :  { %742 = vmatprep.subr.bf16.mxu0 %v943_v0  ;;  %p890_p2 = pnand %p889_p1, %p883_p12 }
  0x65   :  { %703 = vmatmul.mubr.msk.f32.vlgmr.msra.gmra.mrb[0].mxu0 %vm104_vm1, %v1076_v8 }
  0x66   :  { %733 = vmatprep.mubr.msk.f32.mxu0 %vm944_vm0, %v945_v1  ;;  %744 = vmatpush3.bf16.msra.mxu0 %v743_v44 }
  0x67   :  { %745 = vmatprep.subr.bf16.mxu0 %v943_v0 }
  0x6a   :  { %747 = vmatpush3.bf16.msra.mxu0 %v746_v46 }
 0x138   :  { %v174_v10 = vpop.f32.mrb[0].mxu0 }
 0x139   :  { %v178_v11 = vmul.f32 0.25, %v174_v10  ;;  %v704_v12 = vpop.f32.mrb[1].mxu0 }
 0x13b   :  { %346 = vrot.lane.b32.xlu1 %v178_v11, %s946_s4  ;;  %708 = vmatmul.mubr.msk.f32.vlgmr.msra.gmra.mrb[0].mxu1 %vm180_vm2, %v178_v11 }
 0x13c   :  { %712 = vmatprep.mubr.msk.f32.mxu1 %vm944_vm0, %v945_v1  ;;  %711 = vmatpush3.msra.mxu1 %v270_v21 }
 0x13d   :  { %715 = vmatprep.subr.mxu1 %v945_v1 }
 0x1ad   :  { %v347_v26 = vpop.permute.xlu1 %346 }
 0x20e   :  { %v253_v13 = vpop.f32.mrb[0].mxu1 }
 0x20f   :  { %v709_v14 = vpop.f32.mrb[1].mxu1  ;;  %v258_v15 = vsel %vm257_vm3, %v253_v13, -inf }
 0x210   :  { %259 = vmax.xlane.f32.xlu0 %v258_v15 }
 0x29d   :  { %v260_v16 = vpop.xlane.xlu0 %259 }
 0x29e   :  { %v261_v17 = vsub.f32 %v253_v13, %v260_v16 }
 0x2a0   :  { %v262_v18 = vmul.f32 1.442695, %v261_v17 }
 0x2a2   :  { %762 = vpow2.f32 %v262_v18 }
 0x2ac   :  { %v763_v19 = vpop.eup %762 }
 0x2ad   :  { %v264_v20 = vsel %vm257_vm3, %v763_v19, 0.0 }
 0x2ae   :  { %265 = vadd.xlane.f32.xlu0 %v264_v20 }
 0x33b   :  { %v266_v22 = vpop.xlane.xlu0 %265 }
 0x33c   :  { %764 = vrcp.f32 %v266_v22 }
 0x346   :  { %v765_v23 = vpop.eup %764 }
 0x347   :  { %v268_v24 = vmul.f32 %v765_v23, %v763_v19 }
 0x349   :  { %269 = vst.msk [vmem:[#allocation12] sm:$0xff] %vm257_vm3, %v268_v24  ;;  %713 = vmatmul.mubr.msk.f32.vlgmr.msra.gmra.mrb[2].mxu1 %vm257_vm3, %v268_v24 }
 0x34a   :  { %716 = vmatpush3.xpose.msk.msra.mxu1 %vm180_vm2, %v345_v25  ;;  %717 = vmatprep.mubr.msk.f32.mxu1 %vm944_vm0, %v945_v1 }
 0x34b   :  { %720 = vmatprep.subr.mxu1 %v945_v1 }
 0x34d   :  { %718 = vmatmul.mubr.msk.f32.vlgmr.msra.gmra.mrb[4].mxu1 %vm180_vm2, %v347_v26 }
 0x34e   :  { %722 = vmatprep.mubr.msk.f32.mxu1 %vm944_vm0, %v945_v1  ;;  %721 = vmatpush3.msra.mxu1 %v437_v37 }
 0x41c   :  { %v340_v27 = vpop.f32.mrb[2].mxu1 }
 0x41d   :  { %v714_v28 = vpop.f32.mrb[3].mxu1 }
 0x420   :  { %v419_v29 = vpop.f32.mrb[4].mxu1 }
 0x421   :  { %v719_v30 = vpop.f32.mrb[5].mxu1  ;;  %v423_v31 = vsel %vm257_vm3, %v419_v29, -inf }
 0x422   :  { %424 = vmax.xlane.f32.xlu1 %v423_v31 }
 0x4af   :  { %v425_v32 = vpop.xlane.xlu1 %424 }
 0x4b0   :  { %v426_v33 = vsub.f32 %v419_v29, %v425_v32 }
 0x4b2   :  { %v427_v34 = vmul.f32 1.442695, %v426_v33 }
 0x4b4   :  { %766 = vpow2.f32 %v427_v34 }
 0x4be   :  { %v767_v35 = vpop.eup %766 }
 0x4bf   :  { %v429_v36 = vsel %vm257_vm3, %v767_v35, 0.0 }
 0x4c0   :  { %430 = vadd.xlane.f32.xlu0 %v429_v36 }
 0x54d   :  { %v431_v38 = vpop.xlane.xlu0 %430 }
 0x54e   :  { %768 = vrcp.f32 %v431_v38 }
 0x558   :  { %v769_v39 = vpop.eup %768 }
 0x559   :  { %v433_v40 = vmul.f32 %v769_v39, %v767_v35 }
 0x55b   :  { %435 = vst.msk [vmem:[#allocation12 + $0x8] sm:$0xff] %vm257_vm3, %v433_v40  ;;  %723 = vmatmul.mubr.msk.f32.vlgmr.msra.gmra.mrb[6].mxu1 %vm257_vm3, %v433_v40 }
 0x62e   :  { %v507_v47 = vpop.f32.mrb[6].mxu1 }
 0x62f   :  { %512 = vrot.lane.b32.xlu0 %v507_v47, %s947_s28  ;;  %v724_v48 = vpop.f32.mrb[7].mxu1 }
 0x6a1   :  { %v513_v49 = vpop.permute.xlu0 %512 }
 0x6a2   :  { %v515_v50 = vsel %vm180_vm2, %v340_v27, %v513_v49 }
 0x6a3   :  { %734 = vmatmul.mubr.msk.f32.vlgmr.msra.gmra.mrb[2].mxu0 %vm104_vm1, %v515_v50 }
 0x776   :  { %v596_v52 = vpop.f32.mrb[2].mxu0 }
 0x777   :  { %v597_v53 = vadd.f32 %v672_v51, %v596_v52  ;;  %v735_v54 = vpop.f32.mrb[3].mxu0 }
 0x779   :  { %v600_v55 = vadd.f32 %v597_v53, %v1076_v8 }
 0x77b   :  { %v601_v56 = vsel %vm104_vm1, %v600_v55, 0.0 }
 0x77c   :  { %602 = vadd.xlane.f32.xlu0 %v601_v56 }
 0x809   :  { %v603_v57 = vpop.xlane.xlu0 %602 }
 0x80a   :  { %v605_v58 = vmul.f32 0.03125, %v603_v57 }
 0x80c   :  { %v606_v59 = vsub.f32 %v600_v55, %v605_v58 }
 0x80e   :  { %v607_v60 = vmul.f32 %v606_v59, %v606_v59 }
 0x810   :  { %v608_v61 = vsel %vm104_vm1, %v607_v60, 0.0 }
 0x811   :  { %609 = vadd.xlane.f32.xlu1 %v608_v61 }
 0x812   :  { %893 = shalt.err (!%p890_p2)
}
 0x813   :  { %s894_s10 = scalar_lea.hbm %s1149_s9, 256 }
 0x814   :  { %p895_p3 = scmp.ne.s32.totalorder %s1149_s9, %s894_s10  ;;  %p898_p4 = scmp.lt.u32.totalorder %s894_s10, %s1149_s9 }
 0x816   :  { %p900_p5 = pnand %p898_p4, %p895_p3 }
 0x818   :  { %903 = shalt.err (!%p900_p5)
}
 0x819   :  { %653 = dma.vmem_to_hbm [thread:$0]  %s648_s12, 256, %s1149_s9, [#allocation13], %s937_s19, %s937_s19, %s938_s20  }
 0x81a   :  { %v674_v2 = vld [vmem:[%s1146_s6] ss:$0 sm:$0xff]  ;;  %s949_s25 = smov [#allocation11]  }
 0x81b   :  { %v675_v4 = vld [vmem:[%s1147_s7] ss:$0 sm:$0xff]  ;;  %s638_s3 = sshll.u32 %s949_s25, 4  ;;  %s639_s3 = int_to_ptr.vmem [resolvable:$true] %s638_s3 }
 0x81c   :  { %s904_s9 = scalar_lea.vmem %s639_s3, 128  ;;  %p909_p7 = scmp.lt.s32.totalorder %s639_s3, %s639_s3 }
 0x81d   :  { %p905_p6 = scmp.ne.s32.totalorder %s639_s3, %s904_s9  ;;  %p910_p8 = scmp.lt.s32.totalorder %s904_s9, %s904_s9 }
 0x81f   :  { %p911_p9 = por %p910_p8, %p909_p7 }
 0x821   :  { %p912_p10 = pnand %p911_p9, %p905_p6 }
 0x89e   :  { %v610_v62 = vpop.xlane.xlu1 %609 }
 0x89f   :  { %v611_v63 = vmul.f32 0.03125, %v610_v62 }
 0x8a1   :  { %v612_v0 = vadd.f32 1e-05, %v611_v63 }
 0x8a3   :  { %770 = vrsqrt.f32 %v612_v0 }
 0x8ad   :  { %v771_v1 = vpop.eup %770 }
 0x8ae   :  { %v614_v3 = vmul.f32 %v771_v1, %v606_v59 }
 0x8b0   :  { %v622_v5 = vmul.f32 %v674_v2, %v614_v3 }
 0x8b2   :  { %v630_v6 = vadd.f32 %v675_v4, %v622_v5 }
 0x8b4   :  { %631 = vst.msk [vmem:[#allocation11] sm:$0xff] %vm104_vm1, %v630_v6 }
 0x8b5   :  { %915 = shalt.err (!%p912_p10)
}
 0x8b6   :  { %s916_s20 = scalar_lea.hbm %s1148_s8, 128 }
 0x8b7   :  { %p917_p11 = scmp.ne.s32.totalorder %s1148_s8, %s916_s20  ;;  %p920_p12 = scmp.lt.u32.totalorder %s916_s20, %s1148_s8 }
 0x8b9   :  { %p922_p13 = pnand %p920_p12, %p917_p11 }
 0x8bb   :  { %925 = shalt.err (!%p922_p13)
}
 0x8bc   :  { %641 = dma.vmem_to_hbm [thread:$0]  %s639_s3, 128, %s1148_s8, [#allocation4]  }
 0x8bd   :  { %932 = dma.done.wait [#allocation4], 128  }
 0x8be   :  { %933 = vsyncadd [#allocation4], 4294967168 }
 0x8bf   :  { %934 = dma.done.wait [#allocation13], 256  }
 0x8c0   :  { %935 = vsyncadd [#allocation13], 4294967040 }
 0x8c1   :  { %660 = vsyncpa [#allocation3], 1 }
 0x8c2   :  { %661 = vsyncpa [#allocation6], 1 }
 0x8c3   :  { %662 = vsyncpa [#allocation9], 1 }
 0x8c4   :  { %663 = vsyncpa [#allocation4], 1 }
 0x8c5   :  { %664 = vsyncpa [#allocation13], 1 }

</bundles_post_ra>
